<compile_context>
chip_gen: v6e
topology: v6e:2x2x1
jax: 0.10.0
libtpu: 0.0.40
codegen_flags: <defaults>
</compile_context>

<pallas_src>
import functools

import jax
import jax.numpy as jnp
from jax.experimental import pallas as pl
from jax.experimental.pallas import tpu as pltpu


def _round_up(x, m):
    return (x + m - 1) // m * m


def alphazero_kernel(x_ref, w1_ref, w23_ref, b_ref, out_ref, *, K_h, OUT, value_col):
    """One batch tile.

    x_ref:   (TM, in_dim) f32   -- streamed batch tile
    w1_ref:  (in_dim, K_h) bf16 -- resident, single-buffered
    w23_ref: (K_h, K_h + OUT) bf16 (cols [0,K_h)=W2, [K_h, K_h+OUT)=fused heads)
    b_ref:   (1, 2*K_h + OUT) f32 (b1 | b2 | b_heads)
    out_ref: (TM, OUT) bf16     -- policy logits; tanh(value) at column value_col
    """
    x = x_ref[...].astype(jnp.bfloat16)          # f32 -> bf16 in-register, no extra HBM pass

    # fc1 + relu (bf16 MXU operands, f32 accumulate / f32 elementwise)
    h1 = jnp.dot(x, w1_ref[...], preferred_element_type=jnp.float32)
    h1 = jnp.maximum(h1 + b_ref[:, 0:K_h], 0.0)

    # fc2 + relu
    h2 = jnp.dot(h1.astype(jnp.bfloat16), w23_ref[:, 0:K_h],
                 preferred_element_type=jnp.float32)
    h2 = jnp.maximum(h2 + b_ref[:, K_h:2 * K_h], 0.0)

    # fused heads: one MXU pass for [policy | value]
    heads = jnp.dot(h2.astype(jnp.bfloat16), w23_ref[:, K_h:],
                    preferred_element_type=jnp.float32) + b_ref[:, 2 * K_h:]

    if OUT > 128:  # static: these columns are pure policy, never touched by tanh
        out_ref[:, :OUT - 128] = heads[:, :OUT - 128].astype(out_ref.dtype)

    # The last 128-lane block contains the value column: tanh only that lane
    # (keeps EUP work at 128 lanes/row regardless of policy width).
    last = heads[:, OUT - 128:]
    col = jax.lax.broadcasted_iota(jnp.int32, last.shape, 1) + (OUT - 128)
    last = jnp.where(col == value_col, jnp.tanh(last), last)
    out_ref[:, OUT - 128:] = last.astype(out_ref.dtype)


def pack_params(params, input_dim, hidden_dim, policy_dim):
    """Pack weights into one bf16 W1 array + one bf16 [W2 | heads] slab + one
    f32 bias slab (128-lane padded; done once at init, not per call).
    The value head lives in a padding lane of the last policy 128-block when
    policy_dim is not a multiple of 128, otherwise in one extra 128-block."""
    K_h = _round_up(hidden_dim, 128)
    P_pad = _round_up(policy_dim, 128)
    if P_pad > policy_dim:
        OUT = P_pad                    # value fits in policy padding lanes
        value_col = policy_dim
    else:
        OUT = P_pad + 128              # need one extra lane-dense block
        value_col = P_pad

    w1 = jnp.zeros((input_dim, K_h), jnp.float32)
    w1 = w1.at[:, :hidden_dim].set(params["w1"])

    w23 = jnp.zeros((K_h, K_h + OUT), jnp.float32)
    w23 = w23.at[:hidden_dim, :hidden_dim].set(params["w2"])
    w23 = w23.at[:hidden_dim, K_h:K_h + policy_dim].set(params["wp"])
    w23 = w23.at[:hidden_dim, K_h + value_col:K_h + value_col + 1].set(params["wv"])

    b = jnp.zeros((1, 2 * K_h + OUT), jnp.float32)
    b = b.at[:, :hidden_dim].set(params["b1"])
    b = b.at[:, K_h:K_h + hidden_dim].set(params["b2"])
    b = b.at[:, 2 * K_h:2 * K_h + policy_dim].set(params["bp"])
    b = b.at[:, 2 * K_h + value_col:2 * K_h + value_col + 1].set(params["bv"])

    meta = dict(K_h=K_h, OUT=OUT, value_col=value_col,
                input_dim=input_dim, policy_dim=policy_dim)
    return w1.astype(jnp.bfloat16), w23.astype(jnp.bfloat16), b, meta


def _pick_block_m(B):
    """Large, DMA-efficient batch tiles, but keep >= 2 grid steps so the
    'parallel' batch axis is actually split across v7x's two TensorCores."""
    for bm in (512, 256, 128):
        if B >= 2 * bm:
            return bm
    return 128


def _resident_spec(block_shape):
    """Grid-invariant block: keep resident and request a single VMEM buffer
    (double-buffering a constant-index block just wastes VMEM)."""
    try:
        return pl.BlockSpec(block_shape, lambda i: (0, 0),
                            pipeline_mode=pl.Buffered(1))
    except TypeError:  # older jax without pipeline_mode: correctness unaffected
        return pl.BlockSpec(block_shape, lambda i: (0, 0))


def alphazero_forward(x, w1, w23, b, meta, *, block_m=None):
    """x: (B, input_dim) f32.  Returns (policy_logits (B, policy_dim) bf16,
    value (B, 1) bf16)."""
    B, in_dim = x.shape
    K_h, OUT, value_col = meta["K_h"], meta["OUT"], meta["value_col"]
    policy_dim = meta["policy_dim"]
    assert in_dim == meta["input_dim"]

    if block_m is None:
        block_m = _pick_block_m(B)
    B_pad = _round_up(max(B, block_m), block_m)
    if B_pad != B:
        # Only the batch axis is padded (features stay native width); skipped
        # entirely when B divides block_m.
        x = jnp.pad(x, ((0, B_pad - B), (0, 0)))

    grid = (B_pad // block_m,)

    cost = pl.CostEstimate(
        flops=int(2 * B_pad * (in_dim * K_h + K_h * K_h + K_h * OUT)),
        transcendentals=int(B_pad * 128),
        bytes_accessed=int(B_pad * in_dim * 4 + w1.size * 2 + w23.size * 2
                           + b.size * 4 + B_pad * OUT * 2),
    )

    # VMEM budget: single-buffered resident weights/bias, double-buffered x/out
    # tiles, plus f32 intermediates; generous headroom, capped at v7x's 64 MiB.
    resident = w1.size * 2 + w23.size * 2 + 8 * b.shape[1] * 4
    streamed = 2 * block_m * in_dim * 4 + 2 * block_m * OUT * 2
    scratch = block_m * (2 * K_h + OUT) * 4
    vmem_limit = min(max(2 * (resident + streamed + scratch) + (4 << 20),
                         16 << 20), 64 << 20)

    out = pl.pallas_call(
        functools.partial(alphazero_kernel, K_h=K_h, OUT=OUT, value_col=value_col),
        out_shape=jax.ShapeDtypeStruct((B_pad, OUT), jnp.bfloat16),
        grid=grid,
        in_specs=[
            # x streams at native feature width (last block dim == full dim).
            pl.BlockSpec((block_m, in_dim), lambda i: (i, 0)),
            # Grid-invariant weights / biases stay VMEM-resident, 1 buffer each.
            _resident_spec((in_dim, K_h)),
            _resident_spec((K_h, K_h + OUT)),
            _resident_spec((1, 2 * K_h + OUT)),
        ],
        out_specs=pl.BlockSpec((block_m, OUT), lambda i: (i, 0)),
        compiler_params=pltpu.CompilerParams(
            dimension_semantics=("parallel",),        # v7x: 2 TCs split the batch
            vmem_limit_bytes=int(vmem_limit)),
        cost_estimate=cost,
    )(x, w1, w23, b)

    policy_logits = out[:B, :policy_dim]
    value = out[:B, value_col:value_col + 1]
    return policy_logits, value


def reference_forward(x, params):
    """Pure-JAX reference with the same bf16 operand rounding as the kernel."""
    def bf(a):
        return a.astype(jnp.bfloat16).astype(jnp.float32)

    h1 = jnp.maximum(bf(x) @ bf(params["w1"]) + params["b1"], 0.0)
    h2 = jnp.maximum(bf(h1) @ bf(params["w2"]) + params["b2"], 0.0)
    policy = bf(h2) @ bf(params["wp"]) + params["bp"]
    value = jnp.tanh(bf(h2) @ bf(params["wv"]) + params["bv"])
    return policy, value


def init_params(key, input_dim, hidden_dim, policy_dim):
    """nn.Linear-style fan-in uniform init; weights stored pre-transposed
    as (in_dim, out_dim); biases as (1, out_dim)."""
    ks = jax.random.split(key, 8)

    def lin(kw, kb, fan_in, fan_out):
        bound = 1.0 / (fan_in ** 0.5)
        w = jax.random.uniform(kw, (fan_in, fan_out), jnp.float32, -bound, bound)
        b = jax.random.uniform(kb, (1, fan_out), jnp.float32, -bound, bound)
        return w, b

    w1, b1 = lin(ks[0], ks[1], input_dim, hidden_dim)
    w2, b2 = lin(ks[2], ks[3], hidden_dim, hidden_dim)
    wp, bp = lin(ks[4], ks[5], hidden_dim, policy_dim)
    wv, bv = lin(ks[6], ks[7], hidden_dim, 1)
    return {"w1": w1, "b1": b1, "w2": w2, "b2": b2,
            "wp": wp, "bp": bp, "wv": wv, "bv": bv}


if __name__ == "__main__":
    # Small dims consistent with the module.  Batch chosen so the auto-picked
    # block_m=256 gives two "parallel" grid steps (v7x megacore), and
    # policy_dim chosen not a multiple of 128 so the value head folds into a
    # padding lane of the policy output block.
    B, INPUT_DIM, HIDDEN_DIM, POLICY_DIM = 512, 32, 64, 100

    key = jax.random.PRNGKey(0)
    k_x, k_p = jax.random.split(key)
    x = jax.random.normal(k_x, (B, INPUT_DIM), jnp.float32)
    params = init_params(k_p, INPUT_DIM, HIDDEN_DIM, POLICY_DIM)

    w1, w23, b, meta = pack_params(params, INPUT_DIM, HIDDEN_DIM, POLICY_DIM)

    policy_logits, value = alphazero_forward(x, w1, w23, b, meta)
    jax.block_until_ready((policy_logits, value))

    ref_policy, ref_value = reference_forward(x, params)
    assert policy_logits.shape == (B, POLICY_DIM)
    assert value.shape == (B, 1)
    # Output slab is bf16 (halved HBM writeback) -> compare at bf16-level tol.
    assert jnp.allclose(policy_logits.astype(jnp.float32), ref_policy,
                        atol=2e-2, rtol=2e-2)
    assert jnp.allclose(value.astype(jnp.float32), ref_value,
                        atol=2e-2, rtol=2e-2)

    print("KERNEL_OK")
</pallas_src>

<mosaic_0001>
module attributes {stable_mosaic.version = 11 : i64} {
  func.func @alphazero_kernel(%arg0: i32, %arg1: memref<256x32xf32, #tpu.memory_space<vmem>>, %arg2: memref<32x128xbf16, #tpu.memory_space<vmem>>, %arg3: memref<128x256xbf16, #tpu.memory_space<vmem>>, %arg4: memref<1x384xf32, #tpu.memory_space<vmem>>, %arg5: memref<256x128xbf16, #tpu.memory_space<vmem>>) attributes {dimension_semantics = [#tpu.dimension_semantics<parallel>], iteration_bounds = array<i64: 2>, scalar_prefetch = 0 : i64, scratch_operands = 0 : i64, tpu.core_type = #tpu.core_type<tc>, window_params = [{transform_indices = @transform_0, window_bounds = array<i64: 256, 32>}, {pipeline_mode = #tpu.pipeline_mode<synchronous>, transform_indices = @transform_1, window_bounds = array<i64: 32, 128>}, {pipeline_mode = #tpu.pipeline_mode<synchronous>, transform_indices = @transform_2, window_bounds = array<i64: 128, 256>}, {pipeline_mode = #tpu.pipeline_mode<synchronous>, transform_indices = @transform_3, window_bounds = array<i64: 1, 384>}, {transform_indices = @transform_4, window_bounds = array<i64: 256, 128>}]} {
    %c0 = arith.constant 0 : index
    %c0_0 = arith.constant 0 : index
    %0 = vector.load %arg1[%c0, %c0_0] : memref<256x32xf32, #tpu.memory_space<vmem>>, vector<256x32xf32>
    %1 = arith.truncf %0 : vector<256x32xf32> to vector<256x32xbf16>
    %c0_1 = arith.constant 0 : index
    %c0_2 = arith.constant 0 : index
    %2 = vector.load %arg2[%c0_1, %c0_2] : memref<32x128xbf16, #tpu.memory_space<vmem>>, vector<32x128xbf16>
    %cst = arith.constant dense<0.000000e+00> : vector<256x128xf32>
    %3 = tpu.matmul %1, %2, %cst {dimension_numbers = #tpu.dot_dimension_numbers<[1], [0], [0], [1], [0, 0, 1, 1], [], []>} : vector<256x32xbf16>, vector<32x128xbf16>, vector<256x128xf32> -> vector<256x128xf32>
    %c0_3 = arith.constant 0 : index
    %c0_4 = arith.constant 0 : index
    %4 = vector.load %arg4[%c0_3, %c0_4] : memref<1x384xf32, #tpu.memory_space<vmem>>, vector<1x128xf32>
    %5 = vector.broadcast %4 : vector<1x128xf32> to vector<256x128xf32>
    %6 = arith.addf %3, %5 : vector<256x128xf32>
    %cst_5 = arith.constant 0.000000e+00 : f32
    %7 = vector.broadcast %cst_5 : f32 to vector<256x128xf32>
    %8 = arith.maximumf %6, %7 : vector<256x128xf32>
    %9 = arith.truncf %8 : vector<256x128xf32> to vector<256x128xbf16>
    %c0_6 = arith.constant 0 : index
    %c0_7 = arith.constant 0 : index
    %10 = vector.load %arg3[%c0_6, %c0_7] : memref<128x256xbf16, #tpu.memory_space<vmem>>, vector<128x128xbf16>
    %cst_8 = arith.constant dense<0.000000e+00> : vector<256x128xf32>
    %11 = tpu.matmul %9, %10, %cst_8 {dimension_numbers = #tpu.dot_dimension_numbers<[1], [0], [0], [1], [0, 0, 1, 1], [], []>} : vector<256x128xbf16>, vector<128x128xbf16>, vector<256x128xf32> -> vector<256x128xf32>
    %c0_9 = arith.constant 0 : index
    %c128 = arith.constant 128 : index
    %12 = vector.load %arg4[%c0_9, %c128] : memref<1x384xf32, #tpu.memory_space<vmem>>, vector<1x128xf32>
    %13 = vector.broadcast %12 : vector<1x128xf32> to vector<256x128xf32>
    %14 = arith.addf %11, %13 : vector<256x128xf32>
    %cst_10 = arith.constant 0.000000e+00 : f32
    %15 = vector.broadcast %cst_10 : f32 to vector<256x128xf32>
    %16 = arith.maximumf %14, %15 : vector<256x128xf32>
    %17 = arith.truncf %16 : vector<256x128xf32> to vector<256x128xbf16>
    %c0_11 = arith.constant 0 : index
    %c128_12 = arith.constant 128 : index
    %18 = vector.load %arg3[%c0_11, %c128_12] : memref<128x256xbf16, #tpu.memory_space<vmem>>, vector<128x128xbf16>
    %cst_13 = arith.constant dense<0.000000e+00> : vector<256x128xf32>
    %19 = tpu.matmul %17, %18, %cst_13 {dimension_numbers = #tpu.dot_dimension_numbers<[1], [0], [0], [1], [0, 0, 1, 1], [], []>} : vector<256x128xbf16>, vector<128x128xbf16>, vector<256x128xf32> -> vector<256x128xf32>
    %c0_14 = arith.constant 0 : index
    %c256 = arith.constant 256 : index
    %20 = vector.load %arg4[%c0_14, %c256] : memref<1x384xf32, #tpu.memory_space<vmem>>, vector<1x128xf32>
    %21 = vector.broadcast %20 : vector<1x128xf32> to vector<256x128xf32>
    %22 = arith.addf %19, %21 : vector<256x128xf32>
    %23 = tpu.iota {dimensions = array<i32: 1>} : vector<256x128xi32>
    %c0_i32 = arith.constant 0 : i32
    %24 = vector.broadcast %c0_i32 : i32 to vector<256x128xi32>
    %25 = arith.addi %23, %24 : vector<256x128xi32>
    %c100_i32 = arith.constant 100 : i32
    %26 = vector.broadcast %c100_i32 : i32 to vector<256x128xi32>
    %27 = arith.cmpi eq, %25, %26 : vector<256x128xi32>
    %28 = math.tanh %22 : vector<256x128xf32>
    %29 = arith.select %27, %28, %22 : vector<256x128xi1>, vector<256x128xf32>
    %30 = arith.truncf %29 : vector<256x128xf32> to vector<256x128xbf16>
    %c0_15 = arith.constant 0 : index
    %c0_16 = arith.constant 0 : index
    %31 = vector.load %arg5[%c0_15, %c0_16] : memref<256x128xbf16, #tpu.memory_space<vmem>>, vector<256x128xbf16>
    tpu.vector_store %arg5[%c0_15, %c0_16], %30 {strides = array<i32>} : memref<256x128xbf16, #tpu.memory_space<vmem>>, vector<256x128xbf16>,
    return
  }
  func.func @transform_0(%arg0: i32) -> (i32, i32) {
    %c0_i32 = arith.constant 0 : i32
    %c0_i32_0 = arith.constant 0 : i32
    return %arg0, %c0_i32 : i32, i32
  }
  func.func @transform_1(%arg0: i32) -> (i32, i32) {
    %c0_i32 = arith.constant 0 : i32
    %c0_i32_0 = arith.constant 0 : i32
    %c0_i32_1 = arith.constant 0 : i32
    return %c0_i32, %c0_i32_0 : i32, i32
  }
  func.func @transform_2(%arg0: i32) -> (i32, i32) {
    %c0_i32 = arith.constant 0 : i32
    %c0_i32_0 = arith.constant 0 : i32
    %c0_i32_1 = arith.constant 0 : i32
    return %c0_i32, %c0_i32_0 : i32, i32
  }
  func.func @transform_3(%arg0: i32) -> (i32, i32) {
    %c0_i32 = arith.constant 0 : i32
    %c0_i32_0 = arith.constant 0 : i32
    %c0_i32_1 = arith.constant 0 : i32
    return %c0_i32, %c0_i32_0 : i32, i32
  }
  func.func @transform_4(%arg0: i32) -> (i32, i32) {
    %c0_i32 = arith.constant 0 : i32
    %c0_i32_0 = arith.constant 0 : i32
    return %arg0, %c0_i32 : i32, i32
  }
}

</mosaic_0001>

<bundles_post_ra>
// kernel: tpu_custom_call.1
= control target key start
LH: loop header
LB: loop body
LE: loop exit
PB: predicated region body
PF: predicated region fallthrough
CT: control target
= control target key end

     0   :  { %9 = vsyncpa [#allocation3], 0  ;;  %s2389_s0 = inlined_call_operand.vmem [shape: f32[512,32], index: 0, kind: input, shape index: {}]   ;;  %s2390_s1 = inlined_call_operand.vmem [shape: bf16[32,128], index: 1, kind: input, shape index: {}]   ;;  %s2391_s2 = inlined_call_operand.vmem [shape: bf16[128,256], index: 2, kind: input, shape index: {}]   ;;  %s2392_s3 = inlined_call_operand.vmem [shape: f32[1,384], index: 3, kind: input, shape index: {}]   ;;  %s2393_s4 = inlined_call_operand.hbm [shape: bf16[512,128], index: 4, kind: output, shape index: {}]  }
   0x1   :  { %11 = vsyncpa [#allocation3 + $0x1], 0  ;;  %s1968_s15 = smov 0   ;;  %s1970_s16 = smov 0  }
   0x2   :  { %s1972_s17 = smov 0   ;;  %s1974_s18 = smov 0  }
   0x3 LB: > { %s1989_s19 = sadd.s32 4294967295, %s1938_s18   ;;  %s1344_s20 = sadd.s32 4294967294, %s1938_s18   ;;  %s1938_s18 = sphi %s1974_s18, %s2399_s18   ;;  %s1934_s17 = sphi %s1972_s17, %s2398_s17   ;;  %s1930_s16 = sphi %s1970_s16, %s2397_s16   ;;  %s1926_s15 = sphi %s1968_s15, %s2396_s15  }
   0x4   : > { %s1993_s21 = sadd.s32 1, %s1938_s18   ;;  %s113_s22 = sadd.s32 1, %s1934_s17 }
   0x5   : > { %s110_s23 = ssub.s32 %s1938_s18, %s1993_s21  ;;  %p123_p0 = scmp.ne.s32.totalorder %s1934_s17, %s1930_s16 }
   0x6   : > { %p111_p1 = scmp.eq.s32.totalorder %s110_s23, 0  ;;  %p124_p2 = scmp.eq.s32.totalorder %s1989_s19, 1 }
   0x7   : > { %p129_p3 = scmp.ne.s32.totalorder %s1930_s16, %s1926_s15  ;;  %p130_p4 = scmp.eq.s32.totalorder %s1344_s20, 1 }
   0x8   : > { %s2004_s24 = scalar_select %p111_p1, %s1934_s17, %s113_s22  }
   0x9   : > { %p2006_p5 = por %p124_p2, %p123_p0  ;;  %p2010_p6 = por %p130_p4, %p129_p3 }
   0xa   : > { %p1347_p7 = scmp.ge.s32.totalorder %s1938_s18, 1  ;;  %p166_p8 = scmp.lt.s32.totalorder %s1938_s18, 3 }
   0xc   : > { %p167_p9 = pnand %p1347_p7, %p166_p8 }
   0xd   : > { %s1349_s29 = sshll.u32 (!%p167_p9), %s1989_s19, 5  ;;  %s189_s14 = sand.u32 (!%p167_p9), 1, %s1930_s16  }
   0xe   : > { %170 = sbr.rel (%p167_p9) target bundleno = 728 (0x2d8), region = 36  ;;  %p193_p10 = scmp.lt.s32.totalorder (!%p167_p9), %s1349_s29, 63 }
   0xf   : > { %s1348_s20 = sshll.u32 (!%p167_p9), %s189_s14, 7  ;;  %s1457_s23 = sshll.u32 (!%p167_p9), %s1989_s19, 11 }
  0x10   : > { %s2244_s22 = scalar_lea.vmem (!%p167_p9), [#allocation2], %s1348_s20  ;;  %s2341_s19 = scalar_lea.hbm (!%p167_p9), %s2393_s4, %s1457_s23 }
  0x11   : > { %s1282_s27 = sshll.u32 (!%p167_p9), %s2244_s22, 4  ;;  %s2349_s30 = scalar_lea.sflag (!%p167_p9), [#allocation3], %s189_s14  ;;  %s2343_s27 = int_to_ptr.vmem [resolvable:$true] %s1282_s27 }
  0x12   : > { %s1878_s5 = scalar_lea.vmem (!%p167_p9), %s2343_s27, 2048  ;;  %s1940_s6 = smov (!%p167_p9), [#allocation2]  }
  0x13   : > { %v1796_v0 = vld [vmem:[%s2390_s1 + $0x8] sm:$0xff]   ;;  %v1797_v1 = vld [vmem:[%s2390_s1] sm:$0xff]   ;;  %s2401_s29 = smov (!%p193_p10, %s1349_s29), 63  ;;  %v1798_v2 = vld [vmem:[%s2391_s2 + $0x70] ss:$8 sps:$4 sm:$0xff]   ;;  %vm271_vm0 = vcmask 261120   ;;  %p1879_p11 = scmp.ne.s32.totalorder %s2343_s27, %s1878_s5 }
  0x14   : > { %1619 = vmatprep.subr.bf16.mxu0 %v1796_v0  ;;  %1751 = vmatprep.subr.bf16.mxu1 %v1796_v0  ;;  %s1350_s8 = sshll.u32 %s2401_s29, 3  ;;  %v1799_v24 = vld [vmem:[%s2391_s2 + $0x60] ss:$8 sps:$4 sm:$0xff]   ;;  %v1800_v29 = vld [vmem:[%s2391_s2 + $0x50] ss:$8 sps:$4 sm:$0xff]   ;;  %s1882_s7 = sshll.u32 %s1940_s6, 4  ;;  %s1883_s7 = int_to_ptr.vmem [resolvable:$false] %s1882_s7 }
  0x15   : > { %1620 = vmatpush3.bf16.msra.mxu0 %v1796_v0  ;;  %1753 = vmatpush3.bf16.msra.mxu1 %v1796_v0  ;;  %s2029_s11 = scalar_lea.vmem %s2389_s0, %s1350_s8  ;;  %v1801_v38 = vld [vmem:[%s2391_s2 + $0x40] ss:$8 sps:$4 sm:$0xff]   ;;  %v1802_v46 = vld [vmem:[%s2391_s2 + $0x30] ss:$8 sps:$4 sm:$0xff]   ;;  %v1806_v58 = vld [vmem:[%s2391_s2 + $0x74] ss:$8 sps:$4 sm:$0xff]   ;;  %p1880_p12 = pnand %p1879_p11, %p2006_p5 }
  0x16   : > { %1621 = vmatprep.subr.bf16.mxu0 %v1797_v1  ;;  %1752 = vmatprep.subr.bf16.mxu1 %v1797_v1  ;;  %v200_v3 = vld [vmem:[%s2029_s11] sm:$0xff]  ;;  %v201_v4 = vld [vmem:[%s2029_s11 + $0x8] sm:$0xff]  ;;  %v202_v5 = vld [vmem:[%s2029_s11 + $0x10] sm:$0xff]  ;;  %s1884_s8 = scalar_lea.vmem %s1883_s7, 4096  ;;  %p1885_p0 = scmp.lt.s32.totalorder %s2343_s27, %s1883_s7 }
  0x17   : > { %v232_v6 = vpack.c.bf16 %v201_v4, %v200_v3  ;;  %v203_v7 = vld [vmem:[%s2029_s11 + $0x18] sm:$0xff]  ;;  %v204_v8 = vld [vmem:[%s2029_s11 + $0x20] sm:$0xff]  ;;  %v205_v9 = vld [vmem:[%s2029_s11 + $0x28] sm:$0xff]  ;;  %p1881_p13 = pneg %p1880_p12  ;;  %p1886_p1 = scmp.lt.s32.totalorder %s1884_s8, %s1878_s5 }
  0x18   : > { %v233_v10 = vpack.c.bf16 %v203_v7, %v202_v5  ;;  %v234_v11 = vpack.c.bf16 %v205_v9, %v204_v8  ;;  %v206_v12 = vld [vmem:[%s2029_s11 + $0x30] sm:$0xff]  ;;  %v207_v13 = vld [vmem:[%s2029_s11 + $0x38] sm:$0xff]  ;;  %v208_v14 = vld [vmem:[%s2029_s11 + $0x40] sm:$0xff] }
  0x19   : > { %1622 = vmatpush3.bf16.msra.mxu0 %v1797_v1  ;;  %1754 = vmatpush3.bf16.msra.mxu1 %v1797_v1  ;;  %v209_v15 = vld [vmem:[%s2029_s11 + $0x48] sm:$0xff]  ;;  %v216_v16 = vld [vmem:[%s2029_s11 + $0x80] sm:$0xff]  ;;  %v218_v19 = vld [vmem:[%s2029_s11 + $0x90] sm:$0xff]  ;;  %v235_v25 = vpack.c.bf16 %v207_v13, %v206_v12  ;;  %p1887_p2 = por %p1886_p1, %p1885_p0 }
  0x1a   : > { %1655 = vmatprep.subr.bf16.mxu1 %v1798_v2  ;;  %1623 = vmatprep.mubr.msk.bf16.mxu0 %vm271_vm0, %v232_v6  ;;  %v217_v17 = vld [vmem:[%s2029_s11 + $0x88] sm:$0xff]  ;;  %v219_v20 = vld [vmem:[%s2029_s11 + $0x98] sm:$0xff]  ;;  %v220_v21 = vld [vmem:[%s2029_s11 + $0xa0] sm:$0xff]  ;;  %v236_v27 = vpack.c.bf16 %v209_v15, %v208_v14 }
  0x1b   : > { %v240_v18 = vpack.c.bf16 %v217_v17, %v216_v16  ;;  %v241_v22 = vpack.c.bf16 %v219_v20, %v218_v19  ;;  %v221_v23 = vld [vmem:[%s2029_s11 + $0xa8] sm:$0xff]  ;;  %v222_v28 = vld [vmem:[%s2029_s11 + $0xb0] sm:$0xff]  ;;  %v223_v30 = vld [vmem:[%s2029_s11 + $0xb8] sm:$0xff]  ;;  %1703 = vmatprep.subr.bf16.mxu0 %v1806_v58  ;;  %p1888_p3 = pnand %p1887_p2, %p1881_p13 }
  0x1c   : > { %1624 = vmatmul.mubr.msk.bf16.vlgmr.msra.gmra.mxu0 %vm271_vm0, %v233_v10  ;;  %v242_v26 = vpack.c.bf16 %v221_v23, %v220_v21  ;;  %v224_v31 = vld [vmem:[%s2029_s11 + $0xc0] sm:$0xff]  ;;  %v210_v32 = vld [vmem:[%s2029_s11 + $0x50] sm:$0xff]  ;;  %v211_v33 = vld [vmem:[%s2029_s11 + $0x58] sm:$0xff]  ;;  %v243_v37 = vpack.c.bf16 %v223_v30, %v222_v28 }
  0x1d   : > { %1627 = vmatprep.mubr.msk.bf16.mxu0 %vm271_vm0, %v234_v11  ;;  %1639 = vmatprep.mubr.msk.bf16.mxu1 %vm271_vm0, %v240_v18  ;;  %v225_v34 = vld [vmem:[%s2029_s11 + $0xc8] sm:$0xff]  ;;  %v212_v35 = vld [vmem:[%s2029_s11 + $0x60] sm:$0xff]  ;;  %v237_v40 = vpack.c.bf16 %v211_v33, %v210_v32  ;;  %v226_v41 = vld [vmem:[%s2029_s11 + $0xd0] sm:$0xff] }
  0x1e   : > { %1640 = vmatmul.mubr.msk.bf16.vlgmr.msra.gmra.mxu1 %vm271_vm0, %v241_v22  ;;  %v213_v36 = vld [vmem:[%s2029_s11 + $0x68] sm:$0xff]  ;;  %v244_v39 = vpack.c.bf16 %v225_v34, %v224_v31  ;;  %v227_v42 = vld [vmem:[%s2029_s11 + $0xd8] sm:$0xff]  ;;  %v228_v44 = vld [vmem:[%s2029_s11 + $0xe0] sm:$0xff]  ;;  %1704 = vmatpush3.bf16.msra.mxu0 %v1806_v58 }
  0x1f   : > { %1643 = vmatprep.mubr.msk.bf16.mxu1 %vm271_vm0, %v242_v26  ;;  %1656 = vmatpush3.bf16.msra.mxu1 %v1798_v2  ;;  %v238_v43 = vpack.c.bf16 %v213_v36, %v212_v35  ;;  %v229_v45 = vld [vmem:[%s2029_s11 + $0xe8] sm:$0xff]  ;;  %v214_v47 = vld [vmem:[%s2029_s11 + $0x70] sm:$0xff]  ;;  %v215_v48 = vld [vmem:[%s2029_s11 + $0x78] sm:$0xff]  ;;  %v245_v49 = vpack.c.bf16 %v227_v42, %v226_v41 }
  0x20   : > { %1657 = vmatprep.subr.bf16.mxu1 %v1799_v24  ;;  %v246_v50 = vpack.c.bf16 %v229_v45, %v228_v44  ;;  %v239_v51 = vpack.c.bf16 %v215_v48, %v214_v47  ;;  %v230_v52 = vld [vmem:[%s2029_s11 + $0xf0] sm:$0xff]  ;;  %v231_v53 = vld [vmem:[%s2029_s11 + $0xf8] sm:$0xff]  ;;  %v1803_v55 = vld [vmem:[%s2391_s2 + $0x20] ss:$8 sps:$4 sm:$0xff]  }
  0x21   : > { %v247_v54 = vpack.c.bf16 %v231_v53, %v230_v52  ;;  %v1804_v56 = vld [vmem:[%s2391_s2 + $0x10] ss:$8 sps:$4 sm:$0xff]   ;;  %v1805_v57 = vld [vmem:[%s2391_s2] ss:$8 sps:$4 sm:$0xff]   ;;  %v1807_v59 = vld [vmem:[%s2391_s2 + $0x64] ss:$8 sps:$4 sm:$0xff]  }
  0x22   : > { %1705 = vmatprep.subr.bf16.mxu0 %v1807_v59  ;;  %v1808_v60 = vld [vmem:[%s2391_s2 + $0x54] ss:$8 sps:$4 sm:$0xff]   ;;  %v1809_v61 = vld [vmem:[%s2391_s2 + $0x44] ss:$8 sps:$4 sm:$0xff]   ;;  %v2118_v1 = vld [vmem:[%s2392_s3] ss:$0 sm:$0xff] }
  0x23   : > { %1658 = vmatpush3.bf16.msra.mxu1 %v1799_v24  ;;  %1706 = vmatpush3.bf16.msra.mxu0 %v1807_v59  ;;  %v1810_v62 = vld [vmem:[%s2391_s2 + $0x34] ss:$8 sps:$4 sm:$0xff]  }
  0x24   : > { %1628 = vmatmul.mubr.msk.bf16.gmra.mxu0 %vm271_vm0, %v235_v25  ;;  %1659 = vmatprep.subr.bf16.mxu1 %v1800_v29 }
  0x25   : > { %1631 = vmatprep.mubr.msk.bf16.mxu0 %vm271_vm0, %v236_v27  ;;  %1707 = vmatprep.subr.bf16.mxu0 %v1808_v60 }
  0x26   : > { %1644 = vmatmul.mubr.msk.bf16.gmra.mxu1 %vm271_vm0, %v243_v37 }
  0x27   : > { %1647 = vmatprep.mubr.msk.bf16.mxu1 %vm271_vm0, %v244_v39  ;;  %1660 = vmatpush3.bf16.msra.mxu1 %v1800_v29 }
  0x28   : > { %1661 = vmatprep.subr.bf16.mxu1 %v1801_v38  ;;  %1708 = vmatpush3.bf16.msra.mxu0 %v1808_v60 }
  0x29   : > { %1709 = vmatprep.subr.bf16.mxu0 %v1809_v61 }
  0x2b   : > { %1662 = vmatpush3.bf16.msra.mxu1 %v1801_v38 }
  0x2c   : > { %1632 = vmatmul.mubr.msk.bf16.gmra.mxu0 %vm271_vm0, %v237_v40  ;;  %1663 = vmatprep.subr.bf16.mxu1 %v1802_v46 }
  0x2d   : > { %1635 = vmatprep.mubr.msk.bf16.mxu0 %vm271_vm0, %v238_v43  ;;  %1710 = vmatpush3.bf16.msra.mxu0 %v1809_v61 }
  0x2e   : > { %1648 = vmatmul.mubr.msk.bf16.gmra.mxu1 %vm271_vm0, %v245_v49  ;;  %1711 = vmatprep.subr.bf16.mxu0 %v1810_v62 }
  0x2f   : > { %1651 = vmatprep.mubr.msk.bf16.mxu1 %vm271_vm0, %v246_v50  ;;  %1664 = vmatpush3.bf16.msra.mxu1 %v1802_v46 }
  0x30   : > { %1665 = vmatprep.subr.bf16.mxu1 %v1803_v55 }
  0x31   : > { %1712 = vmatpush3.bf16.msra.mxu0 %v1810_v62 }
  0x33   : > { %1666 = vmatpush3.bf16.msra.mxu1 %v1803_v55 }
  0x34   : > { %1636 = vmatmul.mubr.msk.bf16.gmra.mxu0 %vm271_vm0, %v239_v51  ;;  %1667 = vmatprep.subr.bf16.mxu1 %v1804_v56 }
  0x36   : > { %1652 = vmatmul.mubr.msk.bf16.gmra.mxu1 %vm271_vm0, %v247_v54 }
  0x37   : > { %1668 = vmatpush3.bf16.msra.mxu1 %v1804_v56 }
  0x38   : > { %1669 = vmatprep.subr.bf16.mxu1 %v1805_v57 }
  0x3b   : > { %1670 = vmatpush3.bf16.msra.mxu1 %v1805_v57 }
  0xdc   : > { %v1625_v63 = vpop.f32.mrf.mxu0 }
  0xdd   : > { %v363_v6 = vadd.f32 %v1625_v63, %v2118_v1 }
  0xde   : > { %v354_v0 = vpop.f32.mrf.mxu0  ;;  %v2122_v5 = vpop.f32.mrf.mxu1 }
  0xdf   : > { %v355_v3 = vadd.f32 %v2118_v1, %v354_v0  ;;  %v483_v15 = vmax.f32 %v363_v6, 0.0 }
  0xe0   : > { %v1626_v2 = vpop.f32.mrf.mxu0  ;;  %v418_v9 = vpop.f32.mrf.mxu1 }
  0xe1   : > { %v366_v4 = vadd.f32 %v1626_v2, %v2118_v1  ;;  %v481_v12 = vmax.f32 %v355_v3, 0.0  ;;  %v419_v53 = vadd.f32 %v2118_v1, %v418_v9 }
  0xe2   : > { %v357_v7 = vpop.f32.mrf.mxu0  ;;  %v2126_v14 = vpop.f32.mrf.mxu1 }
  0xe3   : > { %v358_v8 = vadd.f32 %v2118_v1, %v357_v7  ;;  %v484_v10 = vmax.f32 %v366_v4, 0.0  ;;  %v497_v62 = vmax.f32 %v419_v53, 0.0  ;;  %v2179_v53 = vld [vmem:[%s2392_s3 + $0x1] ss:$0 sm:$0xff] }
  0xe4   : > { %v1629_v11 = vpop.f32.mrf.mxu0  ;;  %v421_v18 = vpop.f32.mrf.mxu1 }
  0xe5   : > { %v482_v13 = vmax.f32 %v358_v8, 0.0  ;;  %v514_v19 = vpack.c.bf16 %v484_v10, %v483_v15  ;;  %v379_v24 = vadd.f32 %v1629_v11, %v2118_v1  ;;  %v422_v54 = vadd.f32 %v2118_v1, %v421_v18 }
  0xe6   : > { %v370_v16 = vpop.f32.mrf.mxu0  ;;  %v2130_v23 = vpop.f32.mrf.mxu1  ;;  %v430_v15 = vadd.f32 %v2126_v14, %v2118_v1 }
  0xe7   : > { %v513_v17 = vpack.c.bf16 %v482_v13, %v481_v12  ;;  %v371_v21 = vadd.f32 %v2118_v1, %v370_v16  ;;  %v487_v33 = vmax.f32 %v379_v24, 0.0  ;;  %v498_v0 = vmax.f32 %v422_v54, 0.0 }
  0xe8   : > { %v1630_v20 = vpop.f32.mrf.mxu0  ;;  %v434_v27 = vpop.f32.mrf.mxu1  ;;  %v427_v12 = vadd.f32 %v2122_v5, %v2118_v1  ;;  %v443_v5 = vadd.f32 %v2130_v23, %v2118_v1 }
  0xe9   : > { %v382_v22 = vadd.f32 %v1630_v20, %v2118_v1  ;;  %1671 = vmatprep.mubr.bf16.mxu1 %v513_v17  ;;  %v485_v30 = vmax.f32 %v371_v21, 0.0  ;;  %v521_v9 = vpack.c.bf16 %v498_v0, %v497_v62  ;;  %v435_v10 = vadd.f32 %v2118_v1, %v434_v27 }
  0xea   : > { %v373_v25 = vpop.f32.mrf.mxu0  ;;  %1672 = vmatmul.mubr.bf16.vlgmr.msra.gmra.mxu1 %v514_v19  ;;  %v2134_v32 = vpop.f32.mrf.mxu1  ;;  %v499_v19 = vmax.f32 %v427_v12, 0.0  ;;  %v500_v20 = vmax.f32 %v430_v15, 0.0 }
  0xeb   : > { %v374_v26 = vadd.f32 %v2118_v1, %v373_v25  ;;  %v488_v28 = vmax.f32 %v382_v22, 0.0  ;;  %v501_v17 = vmax.f32 %v435_v10, 0.0  ;;  %v446_v14 = vadd.f32 %v2134_v32, %v2118_v1 }
  0xec   : > { %v1633_v29 = vpop.f32.mrf.mxu0  ;;  %v437_v36 = vpop.f32.mrf.mxu1 }
  0xed   : > { %v486_v31 = vmax.f32 %v374_v26, 0.0  ;;  %v516_v37 = vpack.c.bf16 %v488_v28, %v487_v33  ;;  %v395_v42 = vadd.f32 %v1633_v29, %v2118_v1  ;;  %v438_v11 = vadd.f32 %v2118_v1, %v437_v36 }
  0xee   : > { %v386_v34 = vpop.f32.mrf.mxu0  ;;  %v2138_v41 = vpop.f32.mrf.mxu1  ;;  %v522_v26 = vpack.c.bf16 %v500_v20, %v499_v19 }
  0xef   : > { %v515_v35 = vpack.c.bf16 %v486_v31, %v485_v30  ;;  %v387_v39 = vadd.f32 %v2118_v1, %v386_v34  ;;  %v491_v50 = vmax.f32 %v395_v42, 0.0  ;;  %v502_v18 = vmax.f32 %v438_v11, 0.0 }
  0xf0   : > { %v1634_v38 = vpop.f32.mrf.mxu0  ;;  %v450_v47 = vpop.f32.mrf.mxu1  ;;  %v503_v30 = vmax.f32 %v443_v5, 0.0  ;;  %v504_v31 = vmax.f32 %v446_v14, 0.0  ;;  %v459_v23 = vadd.f32 %v2138_v41, %v2118_v1  ;;  %v1811_v41 = vld [vmem:[%s2391_s2 + $0x24] ss:$8 sps:$4 sm:$0xff]  }
  0xf1   : > { %v398_v40 = vadd.f32 %v1634_v38, %v2118_v1  ;;  %1675 = vmatprep.mubr.bf16.mxu1 %v515_v35  ;;  %v489_v48 = vmax.f32 %v387_v39, 0.0  ;;  %v523_v22 = vpack.c.bf16 %v502_v18, %v501_v17  ;;  %v451_v24 = vadd.f32 %v2118_v1, %v450_v47  ;;  %1713 = vmatprep.subr.bf16.mxu0 %v1811_v41 }
  0xf2   : > { %v389_v43 = vpop.f32.mrf.mxu0  ;;  %1676 = vmatmul.mubr.bf16.gmra.mxu1 %v516_v37  ;;  %v1650_v57 = vpop.f32.mrf.mxu1  ;;  %v524_v37 = vpack.c.bf16 %v504_v31, %v503_v30  ;;  %1714 = vmatpush3.bf16.msra.mxu0 %v1811_v41 }
  0xf3   : > { %v390_v44 = vadd.f32 %v2118_v1, %v389_v43  ;;  %v492_v45 = vmax.f32 %v398_v40, 0.0  ;;  %v505_v28 = vmax.f32 %v451_v24, 0.0  ;;  %v462_v38 = vadd.f32 %v1650_v57, %v2118_v1 }
  0xf4   : > { %v1637_v46 = vpop.f32.mrf.mxu0  ;;  %v453_v3 = vpop.f32.mrf.mxu1  ;;  %v507_v40 = vmax.f32 %v459_v23, 0.0 }
  0xf5   : > { %v490_v49 = vmax.f32 %v390_v44, 0.0  ;;  %v518_v55 = vpack.c.bf16 %v492_v45, %v491_v50  ;;  %v411_v60 = vadd.f32 %v1637_v46, %v2118_v1  ;;  %v454_v25 = vadd.f32 %v2118_v1, %v453_v3  ;;  %v1812_v50 = vld [vmem:[%s2391_s2 + $0x14] ss:$8 sps:$4 sm:$0xff]  }
  0xf6   : > { %v402_v51 = vpop.f32.mrf.mxu0  ;;  %v1653_v16 = vpop.f32.mrf.mxu1  ;;  %v508_v42 = vmax.f32 %v462_v38, 0.0  ;;  %1715 = vmatprep.subr.bf16.mxu0 %v1812_v50 }
  0xf7   : > { %v517_v52 = vpack.c.bf16 %v490_v49, %v489_v48  ;;  %v403_v58 = vadd.f32 %v2118_v1, %v402_v51  ;;  %v495_v7 = vmax.f32 %v411_v60, 0.0  ;;  %v506_v29 = vmax.f32 %v454_v25, 0.0  ;;  %1716 = vmatpush3.bf16.msra.mxu0 %v1812_v50 }
  0xf8   : > { %v1638_v56 = vpop.f32.mrf.mxu0  ;;  %v466_v21 = vpop.f32.mrf.mxu1  ;;  %v526_v44 = vpack.c.bf16 %v508_v42, %v507_v40  ;;  %v475_v45 = vadd.f32 %v1653_v16, %v2118_v1 }
  0xf9   : > { %v414_v59 = vadd.f32 %v1638_v56, %v2118_v1  ;;  %1679 = vmatprep.mubr.bf16.mxu1 %v517_v52  ;;  %v493_v4 = vmax.f32 %v403_v58, 0.0  ;;  %v525_v34 = vpack.c.bf16 %v506_v29, %v505_v28  ;;  %v467_v35 = vadd.f32 %v2118_v1, %v466_v21 }
  0xfa   : > { %v405_v61 = vpop.f32.mrf.mxu0  ;;  %1680 = vmatmul.mubr.bf16.gmra.mxu1 %v518_v55  ;;  %v1654_v27 = vpop.f32.mrf.mxu1  ;;  %v511_v47 = vmax.f32 %v475_v45, 0.0 }
  0xfb   : > { %v406_v63 = vadd.f32 %v2118_v1, %v405_v61  ;;  %v496_v2 = vmax.f32 %v414_v59, 0.0  ;;  %v509_v32 = vmax.f32 %v467_v35, 0.0  ;;  %v478_v46 = vadd.f32 %v1654_v27, %v2118_v1 }
  0xfc   : > { %v469_v33 = vpop.f32.mrf.mxu1 }
  0xfd   : > { %v494_v6 = vmax.f32 %v406_v63, 0.0  ;;  %v520_v13 = vpack.c.bf16 %v496_v2, %v495_v7  ;;  %v470_v36 = vadd.f32 %v2118_v1, %v469_v33  ;;  %v512_v48 = vmax.f32 %v478_v46, 0.0  ;;  %v1813_v1 = vld [vmem:[%s2391_s2 + $0x4] ss:$8 sps:$4 sm:$0xff]  }
  0xfe   : > { %1717 = vmatprep.subr.bf16.mxu0 %v1813_v1 }
  0xff   : > { %v519_v8 = vpack.c.bf16 %v494_v6, %v493_v4  ;;  %v510_v39 = vmax.f32 %v470_v36, 0.0  ;;  %v528_v49 = vpack.c.bf16 %v512_v48, %v511_v47  ;;  %1718 = vmatpush3.bf16.msra.mxu0 %v1813_v1 }
 0x101   : > { %1683 = vmatprep.mubr.bf16.mxu1 %v519_v8  ;;  %v527_v43 = vpack.c.bf16 %v510_v39, %v509_v32 }
 0x102   : > { %1684 = vmatmul.mubr.bf16.gmra.mxu1 %v520_v13 }
 0x103   : > { %1687 = vmatprep.mubr.bf16.mxu1 %v521_v9 }
 0x10a   : > { %1688 = vmatmul.mubr.bf16.gmra.mxu1 %v522_v26 }
 0x10b   : > { %1691 = vmatprep.mubr.bf16.mxu1 %v523_v22 }
 0x112   : > { %1692 = vmatmul.mubr.bf16.gmra.mxu1 %v524_v37 }
 0x113   : > { %1695 = vmatprep.mubr.bf16.mxu1 %v525_v34 }
 0x11a   : > { %1696 = vmatmul.mubr.bf16.gmra.mxu1 %v526_v44 }
 0x11b   : > { %1699 = vmatprep.mubr.bf16.mxu1 %v527_v43 }
 0x122   : > { %1700 = vmatmul.mubr.bf16.gmra.mxu1 %v528_v49 }
 0x1aa   : > { %v1673_v51 = vpop.f32.mrf.mxu1 }
 0x1ab   : > { %v643_v57 = vadd.f32 %v1673_v51, %v2179_v53 }
 0x1ac   : > { %v634_v52 = vpop.f32.mrf.mxu1 }
 0x1ad   : > { %v635_v55 = vadd.f32 %v2179_v53, %v634_v52  ;;  %v763_v0 = vmax.f32 %v643_v57, 0.0 }
 0x1ae   : > { %v1674_v54 = vpop.f32.mrf.mxu1 }
 0x1af   : > { %v646_v56 = vadd.f32 %v1674_v54, %v2179_v53  ;;  %v761_v62 = vmax.f32 %v635_v55, 0.0 }
 0x1b0   : > { %v637_v58 = vpop.f32.mrf.mxu1 }
 0x1b1   : > { %v638_v59 = vadd.f32 %v2179_v53, %v637_v58  ;;  %v764_v60 = vmax.f32 %v646_v56, 0.0 }
 0x1b2   : > { %v1677_v61 = vpop.f32.mrf.mxu1 }
 0x1b3   : > { %v762_v63 = vmax.f32 %v638_v59, 0.0  ;;  %v794_v4 = vpack.c.bf16 %v764_v60, %v763_v0  ;;  %v659_v9 = vadd.f32 %v1677_v61, %v2179_v53 }
 0x1b4   : > { %v650_v2 = vpop.f32.mrf.mxu1 }
 0x1b5   : > { %v793_v3 = vpack.c.bf16 %v762_v63, %v761_v62  ;;  %v651_v7 = vadd.f32 %v2179_v53, %v650_v2  ;;  %v767_v17 = vmax.f32 %v659_v9, 0.0 }
 0x1b6   : > { %v1678_v6 = vpop.f32.mrf.mxu1 }
 0x1b7   : > { %v662_v8 = vadd.f32 %v1678_v6, %v2179_v53  ;;  %1719 = vmatprep.mubr.bf16.mxu0 %v793_v3  ;;  %v765_v15 = vmax.f32 %v651_v7, 0.0 }
 0x1b8   : > { %v653_v10 = vpop.f32.mrf.mxu1  ;;  %1720 = vmatmul.mubr.bf16.vlgmr.msra.gmra.mxu0 %v794_v4 }
 0x1b9   : > { %v654_v11 = vadd.f32 %v2179_v53, %v653_v10  ;;  %v768_v12 = vmax.f32 %v662_v8, 0.0 }
 0x1ba   : > { %v1681_v13 = vpop.f32.mrf.mxu1 }
 0x1bb   : > { %v766_v16 = vmax.f32 %v654_v11, 0.0  ;;  %v796_v20 = vpack.c.bf16 %v768_v12, %v767_v17  ;;  %v675_v25 = vadd.f32 %v1681_v13, %v2179_v53 }
 0x1bc   : > { %v666_v18 = vpop.f32.mrf.mxu1 }
 0x1bd   : > { %v795_v19 = vpack.c.bf16 %v766_v16, %v765_v15  ;;  %v667_v22 = vadd.f32 %v2179_v53, %v666_v18  ;;  %v771_v30 = vmax.f32 %v675_v25, 0.0 }
 0x1be   : > { %v1682_v21 = vpop.f32.mrf.mxu1 }
 0x1bf   : > { %v678_v24 = vadd.f32 %v1682_v21, %v2179_v53  ;;  %1723 = vmatprep.mubr.bf16.mxu0 %v795_v19  ;;  %v769_v28 = vmax.f32 %v667_v22, 0.0 }
 0x1c0   : > { %v669_v26 = vpop.f32.mrf.mxu1  ;;  %1724 = vmatmul.mubr.bf16.gmra.mxu0 %v796_v20 }
 0x1c1   : > { %v670_v5 = vadd.f32 %v2179_v53, %v669_v26  ;;  %v772_v14 = vmax.f32 %v678_v24, 0.0 }
 0x1c2   : > { %v1685_v27 = vpop.f32.mrf.mxu1 }
 0x1c3   : > { %v770_v29 = vmax.f32 %v670_v5, 0.0  ;;  %v798_v34 = vpack.c.bf16 %v772_v14, %v771_v30  ;;  %v691_v23 = vadd.f32 %v1685_v27, %v2179_v53 }
 0x1c4   : > { %v682_v31 = vpop.f32.mrf.mxu1 }
 0x1c5   : > { %v797_v33 = vpack.c.bf16 %v770_v29, %v769_v28  ;;  %v683_v36 = vadd.f32 %v2179_v53, %v682_v31  ;;  %v775_v44 = vmax.f32 %v691_v23, 0.0 }
 0x1c6   : > { %v1686_v35 = vpop.f32.mrf.mxu1 }
 0x1c7   : > { %v694_v37 = vadd.f32 %v1686_v35, %v2179_v53  ;;  %1727 = vmatprep.mubr.bf16.mxu0 %v797_v33  ;;  %v773_v42 = vmax.f32 %v683_v36, 0.0 }
 0x1c8   : > { %v685_v38 = vpop.f32.mrf.mxu1  ;;  %1728 = vmatmul.mubr.bf16.gmra.mxu0 %v798_v34 }
 0x1c9   : > { %v686_v32 = vadd.f32 %v2179_v53, %v685_v38  ;;  %v776_v39 = vmax.f32 %v694_v37, 0.0 }
 0x1ca   : > { %v1689_v40 = vpop.f32.mrf.mxu1 }
 0x1cb   : > { %v774_v43 = vmax.f32 %v686_v32, 0.0  ;;  %v800_v47 = vpack.c.bf16 %v776_v39, %v775_v44  ;;  %v707_v50 = vadd.f32 %v1689_v40, %v2179_v53  ;;  %v2216_v32 = vld [vmem:[%s2392_s3 + $0x2] ss:$0 sm:$0xff] }
 0x1cc   : > { %v698_v45 = vpop.f32.mrf.mxu1 }
 0x1cd   : > { %v799_v46 = vpack.c.bf16 %v774_v43, %v773_v42  ;;  %v699_v49 = vadd.f32 %v2179_v53, %v698_v45  ;;  %v779_v57 = vmax.f32 %v707_v50, 0.0 }
 0x1ce   : > { %v1690_v48 = vpop.f32.mrf.mxu1 }
 0x1cf   : > { %v710_v41 = vadd.f32 %v1690_v48, %v2179_v53  ;;  %1731 = vmatprep.mubr.bf16.mxu0 %v799_v46  ;;  %v777_v55 = vmax.f32 %v699_v49, 0.0  ;;  %v1041_v49 = vlaneseq }
 0x1d0   : > { %v701_v1 = vpop.f32.mrf.mxu1  ;;  %1732 = vmatmul.mubr.bf16.gmra.mxu0 %v800_v47 }
 0x1d1   : > { %v702_v51 = vadd.f32 %v2179_v53, %v701_v1  ;;  %v780_v52 = vmax.f32 %v710_v41, 0.0 }
 0x1d2   : > { %v1693_v54 = vpop.f32.mrf.mxu1 }
 0x1d3   : > { %v778_v56 = vmax.f32 %v702_v51, 0.0  ;;  %v802_v60 = vpack.c.bf16 %v780_v52, %v779_v57  ;;  %v723_v0 = vadd.f32 %v1693_v54, %v2179_v53  ;;  %v2225_v52 = vand.u32 127, %v1041_v49 }
 0x1d4   : > { %v714_v58 = vpop.f32.mrf.mxu1 }
 0x1d5   : > { %v801_v59 = vpack.c.bf16 %v778_v56, %v777_v55  ;;  %v715_v62 = vadd.f32 %v2179_v53, %v714_v58  ;;  %v783_v9 = vmax.f32 %v723_v0, 0.0  ;;  %vm1043_vm1 = vcmp.eq.s32.totalorder %v2225_v52, 100 }
 0x1d6   : > { %v1694_v61 = vpop.f32.mrf.mxu1 }
 0x1d7   : > { %v726_v63 = vadd.f32 %v1694_v61, %v2179_v53  ;;  %1735 = vmatprep.mubr.bf16.mxu0 %v801_v59  ;;  %v781_v7 = vmax.f32 %v715_v62, 0.0 }
 0x1d8   : > { %v717_v2 = vpop.f32.mrf.mxu1  ;;  %1736 = vmatmul.mubr.bf16.gmra.mxu0 %v802_v60 }
 0x1d9   : > { %v718_v3 = vadd.f32 %v2179_v53, %v717_v2  ;;  %v784_v4 = vmax.f32 %v726_v63, 0.0 }
 0x1da   : > { %v1697_v6 = vpop.f32.mrf.mxu1 }
 0x1db   : > { %v782_v8 = vmax.f32 %v718_v3, 0.0  ;;  %v804_v12 = vpack.c.bf16 %v784_v4, %v783_v9  ;;  %v739_v17 = vadd.f32 %v1697_v6, %v2179_v53 }
 0x1dc   : > { %v730_v10 = vpop.f32.mrf.mxu1 }
 0x1dd   : > { %v803_v11 = vpack.c.bf16 %v782_v8, %v781_v7  ;;  %v731_v15 = vadd.f32 %v2179_v53, %v730_v10  ;;  %v787_v25 = vmax.f32 %v739_v17, 0.0 }
 0x1de   : > { %v1698_v13 = vpop.f32.mrf.mxu1 }
 0x1df   : > { %v742_v16 = vadd.f32 %v1698_v13, %v2179_v53  ;;  %1739 = vmatprep.mubr.bf16.mxu0 %v803_v11  ;;  %v785_v22 = vmax.f32 %v731_v15, 0.0 }
 0x1e0   : > { %v733_v18 = vpop.f32.mrf.mxu1  ;;  %1740 = vmatmul.mubr.bf16.gmra.mxu0 %v804_v12 }
 0x1e1   : > { %v734_v19 = vadd.f32 %v2179_v53, %v733_v18  ;;  %v788_v20 = vmax.f32 %v742_v16, 0.0 }
 0x1e2   : > { %v1701_v21 = vpop.f32.mrf.mxu1 }
 0x1e3   : > { %v786_v24 = vmax.f32 %v734_v19, 0.0  ;;  %v806_v14 = vpack.c.bf16 %v788_v20, %v787_v25  ;;  %v755_v30 = vadd.f32 %v1701_v21, %v2179_v53 }
 0x1e4   : > { %v746_v26 = vpop.f32.mrf.mxu1 }
 0x1e5   : > { %v805_v5 = vpack.c.bf16 %v786_v24, %v785_v22  ;;  %v747_v28 = vadd.f32 %v2179_v53, %v746_v26  ;;  %v791_v37 = vmax.f32 %v755_v30, 0.0 }
 0x1e6   : > { %v1702_v27 = vpop.f32.mrf.mxu1 }
 0x1e7   : > { %v758_v29 = vadd.f32 %v1702_v27, %v2179_v53  ;;  %1743 = vmatprep.mubr.bf16.mxu0 %v805_v5  ;;  %v789_v35 = vmax.f32 %v747_v28, 0.0 }
 0x1e8   : > { %v749_v31 = vpop.f32.mrf.mxu1  ;;  %1744 = vmatmul.mubr.bf16.gmra.mxu0 %v806_v14 }
 0x1e9   : > { %v750_v33 = vadd.f32 %v2179_v53, %v749_v31  ;;  %v792_v34 = vmax.f32 %v758_v29, 0.0 }
 0x1eb   : > { %v790_v36 = vmax.f32 %v750_v33, 0.0  ;;  %v808_v38 = vpack.c.bf16 %v792_v34, %v791_v37 }
 0x1ed   : > { %v807_v23 = vpack.c.bf16 %v790_v36, %v789_v35 }
 0x1ef   : > { %1747 = vmatprep.mubr.bf16.mxu0 %v807_v23 }
 0x1f0   : > { %1748 = vmatmul.mubr.bf16.gmra.mxu0 %v808_v38 }
 0x278   : > { %v1721_v39 = vpop.f32.mrf.mxu0 }
 0x279   : > { %v923_v40 = vadd.f32 %v1721_v39, %v2216_v32 }
 0x27a   : > { %v914_v42 = vpop.f32.mrf.mxu0 }
 0x27b   : > { %v915_v43 = vadd.f32 %v2216_v32, %v914_v42  ;;  %1814 = vtanh.f32 %v923_v40 }
 0x27c   : > { %v1722_v53 = vpop.f32.mrf.mxu0 }
 0x27d   : > { %v926_v44 = vadd.f32 %v1722_v53, %v2216_v32  ;;  %1816 = vtanh.f32 %v915_v43 }
 0x27e   : > { %v917_v45 = vpop.f32.mrf.mxu0 }
 0x27f   : > { %1818 = vtanh.f32 %v926_v44  ;;  %v918_v46 = vadd.f32 %v2216_v32, %v917_v45 }
 0x280   : > { %v1725_v47 = vpop.f32.mrf.mxu0 }
 0x281   : > { %1820 = vtanh.f32 %v918_v46  ;;  %v939_v48 = vadd.f32 %v1725_v47, %v2216_v32 }
 0x282   : > { %v930_v41 = vpop.f32.mrf.mxu0 }
 0x283   : > { %v931_v50 = vadd.f32 %v2216_v32, %v930_v41  ;;  %1822 = vtanh.f32 %v939_v48 }
 0x284   : > { %v1726_v1 = vpop.f32.mrf.mxu0 }
 0x285   : > { %v942_v51 = vadd.f32 %v1726_v1, %v2216_v32  ;;  %1824 = vtanh.f32 %v931_v50 }
 0x286   : > { %v933_v54 = vpop.f32.mrf.mxu0 }
 0x287   : > { %1826 = vtanh.f32 %v942_v51  ;;  %v934_v55 = vadd.f32 %v2216_v32, %v933_v54 }
 0x288   : > { %v1729_v56 = vpop.f32.mrf.mxu0  ;;  %v1815_v58 = vpop.eup %1814 }
 0x289   : > { %1828 = vtanh.f32 %v934_v55  ;;  %v955_v57 = vadd.f32 %v1729_v56, %v2216_v32  ;;  %v1078_v0 = vsel %vm1043_vm1, %v1815_v58, %v923_v40 }
 0x28a   : > { %v946_v59 = vpop.f32.mrf.mxu0  ;;  %v1817_v60 = vpop.eup %1816 }
 0x28b   : > { %v947_v61 = vadd.f32 %v2216_v32, %v946_v59  ;;  %1830 = vtanh.f32 %v955_v57  ;;  %v1076_v8 = vsel %vm1043_vm1, %v1817_v60, %v915_v43 }
 0x28c   : > { %v1819_v62 = vpop.eup %1818  ;;  %v1730_v63 = vpop.f32.mrf.mxu0 }
 0x28d   : > { %v1079_v2 = vsel %vm1043_vm1, %v1819_v62, %v926_v44  ;;  %v958_v3 = vadd.f32 %v1730_v63, %v2216_v32  ;;  %1832 = vtanh.f32 %v947_v61 }
 0x28e   : > { %v1821_v4 = vpop.eup %1820  ;;  %v1466_v6 = vpack.c.bf16 %v1079_v2, %v1078_v0  ;;  %v949_v7 = vpop.f32.mrf.mxu0 }
 0x28f   : > { %v1077_v9 = vsel %vm1043_vm1, %v1821_v4, %v918_v46  ;;  %1834 = vtanh.f32 %v958_v3  ;;  %v950_v10 = vadd.f32 %v2216_v32, %v949_v7 }
 0x290   : > { %1538 = vst [vmem:[%s2244_s22 + $0x8] sm:$0xff] %v1466_v6   ;;  %v1461_v11 = vpack.c.bf16 %v1077_v9, %v1076_v8  ;;  %v1733_v12 = vpop.f32.mrf.mxu0  ;;  %v1823_v15 = vpop.eup %1822 }
 0x291   : > { %1836 = vtanh.f32 %v950_v10  ;;  %v971_v13 = vadd.f32 %v1733_v12, %v2216_v32  ;;  %v1082_v21 = vsel %vm1043_vm1, %v1823_v15, %v939_v48 }
 0x292   : > { %1462 = vst [vmem:[%s2244_s22] sm:$0xff] %v1461_v11   ;;  %v962_v16 = vpop.f32.mrf.mxu0  ;;  %v1825_v17 = vpop.eup %1824 }
 0x293   : > { %v963_v18 = vadd.f32 %v2216_v32, %v962_v16  ;;  %1838 = vtanh.f32 %v971_v13  ;;  %v1080_v14 = vsel %vm1043_vm1, %v1825_v17, %v931_v50 }
 0x294   : > { %v1827_v19 = vpop.eup %1826  ;;  %v1734_v20 = vpop.f32.mrf.mxu0 }
 0x295   : > { %v1083_v22 = vsel %vm1043_vm1, %v1827_v19, %v942_v51  ;;  %v974_v24 = vadd.f32 %v1734_v20, %v2216_v32  ;;  %1840 = vtanh.f32 %v963_v18 }
 0x296   : > { %v1829_v25 = vpop.eup %1828  ;;  %v1476_v26 = vpack.c.bf16 %v1083_v22, %v1082_v21  ;;  %v965_v5 = vpop.f32.mrf.mxu0 }
 0x297   : > { %v1081_v27 = vsel %vm1043_vm1, %v1829_v25, %v934_v55  ;;  %1842 = vtanh.f32 %v974_v24  ;;  %v966_v28 = vadd.f32 %v2216_v32, %v965_v5 }
 0x298   : > { %1540 = vst [vmem:[%s2244_s22 + $0x18] sm:$0xff] %v1476_v26   ;;  %v1471_v29 = vpack.c.bf16 %v1081_v27, %v1080_v14  ;;  %v1737_v30 = vpop.f32.mrf.mxu0  ;;  %v1831_v33 = vpop.eup %1830 }
 0x299   : > { %1844 = vtanh.f32 %v966_v28  ;;  %v987_v31 = vadd.f32 %v1737_v30, %v2216_v32  ;;  %v1086_v38 = vsel %vm1043_vm1, %v1831_v33, %v955_v57 }
 0x29a   : > { %1539 = vst [vmem:[%s2244_s22 + $0x10] sm:$0xff] %v1471_v29   ;;  %v978_v34 = vpop.f32.mrf.mxu0  ;;  %v1833_v35 = vpop.eup %1832 }
 0x29b   : > { %v979_v36 = vadd.f32 %v2216_v32, %v978_v34  ;;  %1846 = vtanh.f32 %v987_v31  ;;  %v1084_v44 = vsel %vm1043_vm1, %v1833_v35, %v947_v61 }
 0x29c   : > { %v1835_v37 = vpop.eup %1834  ;;  %v1738_v23 = vpop.f32.mrf.mxu0 }
 0x29d   : > { %v1087_v39 = vsel %vm1043_vm1, %v1835_v37, %v958_v3  ;;  %v990_v40 = vadd.f32 %v1738_v23, %v2216_v32  ;;  %1848 = vtanh.f32 %v979_v36 }
 0x29e   : > { %v1837_v42 = vpop.eup %1836  ;;  %v1486_v43 = vpack.c.bf16 %v1087_v39, %v1086_v38  ;;  %v981_v53 = vpop.f32.mrf.mxu0 }
 0x29f   : > { %v1085_v45 = vsel %vm1043_vm1, %v1837_v42, %v950_v10  ;;  %1850 = vtanh.f32 %v990_v40  ;;  %v982_v46 = vadd.f32 %v2216_v32, %v981_v53 }
 0x2a0   : > { %1542 = vst [vmem:[%s2244_s22 + $0x28] sm:$0xff] %v1486_v43   ;;  %v1481_v47 = vpack.c.bf16 %v1085_v45, %v1084_v44  ;;  %v1741_v48 = vpop.f32.mrf.mxu0  ;;  %v1839_v41 = vpop.eup %1838 }
 0x2a1   : > { %1852 = vtanh.f32 %v982_v46  ;;  %v1003_v49 = vadd.f32 %v1741_v48, %v2216_v32  ;;  %v1090_v56 = vsel %vm1043_vm1, %v1839_v41, %v971_v13 }
 0x2a2   : > { %1541 = vst [vmem:[%s2244_s22 + $0x20] sm:$0xff] %v1481_v47   ;;  %v994_v50 = vpop.f32.mrf.mxu0  ;;  %v1841_v1 = vpop.eup %1840 }
 0x2a3   : > { %v995_v51 = vadd.f32 %v2216_v32, %v994_v50  ;;  %1854 = vtanh.f32 %v1003_v49  ;;  %v1088_v62 = vsel %vm1043_vm1, %v1841_v1, %v963_v18 }
 0x2a4   : > { %v1843_v54 = vpop.eup %1842  ;;  %v1742_v55 = vpop.f32.mrf.mxu0 }
 0x2a5   : > { %v1091_v57 = vsel %vm1043_vm1, %v1843_v54, %v974_v24  ;;  %v1006_v58 = vadd.f32 %v1742_v55, %v2216_v32  ;;  %1856 = vtanh.f32 %v995_v51 }
 0x2a6   : > { %v1845_v59 = vpop.eup %1844  ;;  %v1496_v60 = vpack.c.bf16 %v1091_v57, %v1090_v56  ;;  %v997_v61 = vpop.f32.mrf.mxu0 }
 0x2a7   : > { %v1089_v63 = vsel %vm1043_vm1, %v1845_v59, %v966_v28  ;;  %1858 = vtanh.f32 %v1006_v58  ;;  %v998_v0 = vadd.f32 %v2216_v32, %v997_v61 }
 0x2a8   : > { %1544 = vst [vmem:[%s2244_s22 + $0x38] sm:$0xff] %v1496_v60   ;;  %v1491_v2 = vpack.c.bf16 %v1089_v63, %v1088_v62  ;;  %v1745_v3 = vpop.f32.mrf.mxu0  ;;  %v1847_v6 = vpop.eup %1846 }
 0x2a9   : > { %1860 = vtanh.f32 %v998_v0  ;;  %v1019_v4 = vadd.f32 %v1745_v3, %v2216_v32  ;;  %v1094_v12 = vsel %vm1043_vm1, %v1847_v6, %v987_v31 }
 0x2aa   : > { %1543 = vst [vmem:[%s2244_s22 + $0x30] sm:$0xff] %v1491_v2   ;;  %v1010_v7 = vpop.f32.mrf.mxu0  ;;  %v1849_v8 = vpop.eup %1848 }
 0x2ab   : > { %v1011_v9 = vadd.f32 %v2216_v32, %v1010_v7  ;;  %1862 = vtanh.f32 %v1019_v4  ;;  %v1092_v19 = vsel %vm1043_vm1, %v1849_v8, %v979_v36 }
 0x2ac   : > { %v1851_v10 = vpop.eup %1850  ;;  %v1746_v11 = vpop.f32.mrf.mxu0 }
 0x2ad   : > { %v1095_v13 = vsel %vm1043_vm1, %v1851_v10, %v990_v40  ;;  %v1022_v15 = vadd.f32 %v1746_v11, %v2216_v32  ;;  %1864 = vtanh.f32 %v1011_v9 }
 0x2ae   : > { %v1853_v16 = vpop.eup %1852  ;;  %v1506_v17 = vpack.c.bf16 %v1095_v13, %v1094_v12  ;;  %v1013_v18 = vpop.f32.mrf.mxu0 }
 0x2af   : > { %v1093_v20 = vsel %vm1043_vm1, %v1853_v16, %v982_v46  ;;  %1866 = vtanh.f32 %v1022_v15  ;;  %v1014_v21 = vadd.f32 %v2216_v32, %v1013_v18 }
 0x2b0   : > { %1546 = vst [vmem:[%s2244_s22 + $0x48] sm:$0xff] %v1506_v17   ;;  %v1501_v22 = vpack.c.bf16 %v1093_v20, %v1092_v19  ;;  %v1749_v24 = vpop.f32.mrf.mxu0  ;;  %v1855_v26 = vpop.eup %1854 }
 0x2b1   : > { %1868 = vtanh.f32 %v1014_v21  ;;  %v1035_v25 = vadd.f32 %v1749_v24, %v2216_v32  ;;  %v1098_v30 = vsel %vm1043_vm1, %v1855_v26, %v1003_v49 }
 0x2b2   : > { %1545 = vst [vmem:[%s2244_s22 + $0x40] sm:$0xff] %v1501_v22   ;;  %v1026_v5 = vpop.f32.mrf.mxu0  ;;  %v1857_v14 = vpop.eup %1856 }
 0x2b3   : > { %v1027_v27 = vadd.f32 %v2216_v32, %v1026_v5  ;;  %1870 = vtanh.f32 %v1035_v25  ;;  %v1096_v37 = vsel %vm1043_vm1, %v1857_v14, %v995_v51 }
 0x2b4   : > { %v1859_v28 = vpop.eup %1858  ;;  %v1750_v29 = vpop.f32.mrf.mxu0 }
 0x2b5   : > { %v1099_v31 = vsel %vm1043_vm1, %v1859_v28, %v1006_v58  ;;  %v1038_v33 = vadd.f32 %v1750_v29, %v2216_v32  ;;  %1872 = vtanh.f32 %v1027_v27 }
 0x2b6   : > { %v1861_v34 = vpop.eup %1860  ;;  %v1516_v35 = vpack.c.bf16 %v1099_v31, %v1098_v30  ;;  %v1029_v36 = vpop.f32.mrf.mxu0 }
 0x2b7   : > { %v1097_v23 = vsel %vm1043_vm1, %v1861_v34, %v998_v0  ;;  %1874 = vtanh.f32 %v1038_v33  ;;  %v1030_v38 = vadd.f32 %v2216_v32, %v1029_v36 }
 0x2b8   : > { %1548 = vst [vmem:[%s2244_s22 + $0x58] sm:$0xff] %v1516_v35   ;;  %v1511_v39 = vpack.c.bf16 %v1097_v23, %v1096_v37  ;;  %v1863_v40 = vpop.eup %1862 }
 0x2b9   : > { %1876 = vtanh.f32 %v1030_v38  ;;  %v1102_v53 = vsel %vm1043_vm1, %v1863_v40, %v1019_v4 }
 0x2ba   : > { %1547 = vst [vmem:[%s2244_s22 + $0x50] sm:$0xff] %v1511_v39   ;;  %v1865_v42 = vpop.eup %1864 }
 0x2bb   : > { %v1100_v32 = vsel %vm1043_vm1, %v1865_v42, %v1011_v9 }
 0x2bc   : > { %v1867_v43 = vpop.eup %1866 }
 0x2bd   : > { %v1103_v44 = vsel %vm1043_vm1, %v1867_v43, %v1022_v15 }
 0x2be   : > { %v1869_v45 = vpop.eup %1868  ;;  %v1526_v46 = vpack.c.bf16 %v1103_v44, %v1102_v53 }
 0x2bf   : > { %v1101_v47 = vsel %vm1043_vm1, %v1869_v45, %v1014_v21 }
 0x2c0   : > { %1550 = vst [vmem:[%s2244_s22 + $0x68] sm:$0xff] %v1526_v46   ;;  %v1521_v48 = vpack.c.bf16 %v1101_v47, %v1100_v32  ;;  %v1871_v49 = vpop.eup %1870 }
 0x2c1   : > { %v1106_v1 = vsel %vm1043_vm1, %v1871_v49, %v1035_v25 }
 0x2c2   : > { %1549 = vst [vmem:[%s2244_s22 + $0x60] sm:$0xff] %v1521_v48   ;;  %v1873_v41 = vpop.eup %1872 }
 0x2c3   : > { %v1104_v56 = vsel %vm1043_vm1, %v1873_v41, %v1027_v27 }
 0x2c4   : > { %v1875_v50 = vpop.eup %1874 }
 0x2c5   : > { %v1107_v51 = vsel %vm1043_vm1, %v1875_v50, %v1038_v33 }
 0x2c6   : > { %v1877_v54 = vpop.eup %1876  ;;  %v1536_v55 = vpack.c.bf16 %v1107_v51, %v1106_v1 }
 0x2c7   : > { %v1105_v57 = vsel %vm1043_vm1, %v1877_v54, %v1030_v38 }
 0x2c8   : > { %1552 = vst [vmem:[%s2244_s22 + $0x78] sm:$0xff] %v1536_v55   ;;  %v1531_v58 = vpack.c.bf16 %v1105_v57, %v1104_v56 }
 0x2ca   : > { %1551 = vst [vmem:[%s2244_s22 + $0x70] sm:$0xff] %v1531_v58  }
 0x2cb   : > { %1891 = shalt.err (!%p1888_p3)
}
 0x2cc   : > { %s1892_s9 = scalar_lea.hbm %s2341_s19, 2048  ;;  %s1896_s12 = scalar_lea.hbm %s2393_s4, 4096 }
 0x2cd   : > { %p1893_p4 = scmp.ne.s32.totalorder %s2341_s19, %s1892_s9  ;;  %p1897_p9 = scmp.lt.s32.totalorder %s2341_s19, %s2393_s4 }
 0x2ce   : > { %p1898_p10 = scmp.lt.s32.totalorder %s1896_s12, %s1892_s9 }
 0x2cf   : > { %p1894_p7 = pnand %p1893_p4, %p2006_p5 }
 0x2d0   : > { %p1899_p11 = por %p1898_p10, %p1897_p9 }
 0x2d1   : > { %p1895_p8 = pneg %p1894_p7 }
 0x2d3   : > { %p1900_p12 = pnand %p1899_p11, %p1895_p8 }
 0x2d5   : > { %1903 = shalt.err (!%p1900_p12)
}
 0x2d6   : > { %s1941_s20 = smov 64   ;;  %s1942_s22 = smov 4  }
 0x2d7   : > { %1755 = dma.vmem_to_hbm [thread:$0]  (%p2006_p5), %s2343_s27, 2048, %s2341_s19, %s2349_s30, %s1941_s20, %s1941_s20, %s1942_s22  }
 0x2d8 PF: > { %p1761_p13 = scmp.ge.s32.totalorder %s1938_s18, 2  ;;  %s1297_s23 = sand.u32 1, %s1926_s15  }
 0x2d9   : > { %s1298_s28 = scalar_lea.sflag [#allocation3], %s1297_s23 }
 0x2da   : > { %p1758_p0 = pnand %p1761_p13, %p2010_p6 }
 0x2dc   : > { %p1759_p1 = pneg %p1758_p0 }
 0x2de   : > { %1921 = dma.done.wait (%p1759_p1), %s1298_s28, 2048  }
 0x2df   : > { %1923 = vsyncadd (%p1759_p1), %s1298_s28, 4294965248  ;;  %p14_p2 = scmp.ge.s32.totalorder %s1993_s21, 4   ;;  %s2396_s15 = smov %s1930_s16 }
 0x2e0   : > { %s2397_s16 = smov %s1934_s17  ;;  %s2398_s17 = smov %s2004_s24 }
 0x2e1   : > { %s2399_s18 = smov %s1993_s21  ;;  %16 = sbr.rel (!%p14_p2) target bundleno = 3 (0x3), region = 71 }
 0x2e6   :  { %1303 = vsyncpa [#allocation3], 1 }
 0x2e7   :  { %1305 = vsyncpa [#allocation3 + $0x1], 1 }

</bundles_post_ra>
